<compile_context>
chip_gen: v5e
topology: v5e:2x2
jax: 0.10.0
libtpu: 0.0.40
codegen_flags: <defaults>
</compile_context>

<pallas_src>
import functools

import jax
import jax.numpy as jnp
from jax.experimental import pallas as pl
from jax.experimental.pallas import tpu as pltpu


def training_wheels_kernel(
    coords_ref,   # (3, TILE_N)  atom tile: xyz on sublanes, atoms on lanes
    wf_t_ref,     # (H, 3)       fused (descriptor . layer1) weights, transposed
    bf_t_ref,     # (H, 1)       fused bias, transposed
    w2_ref,       # (H, 1)       energy-head weights
    b2_ref,       # (1, 1)       energy-head bias
    v_t_ref,      # (H, 3)       wf_t * w2 (force-path weights, w2 pre-folded)
    e_tile_ref,   # out: (1, 1, 128) per-tile partial energy (broadcast scalar)
    forces_ref,   # out: (3, TILE_N)
    *,
    tile_n: int,
    last_tile_valid: int,  # valid atoms in the LAST tile (== tile_n -> no padding)
):
    x = coords_ref[...]            # (3, TILE_N)
    wf_t = wf_t_ref[...]           # (H, 3)
    w2 = w2_ref[...]               # (H, 1)

    # Fused first layer: pre[h, n] = sum_c Wf[c, h] * x[c, n] + bf[h]
    # K = 3 contraction -> three VPU broadcast FMAs instead of an MXU matmul.
    pre = (wf_t[:, 0:1] * x[0:1, :]
           + wf_t[:, 1:2] * x[1:2, :]
           + wf_t[:, 2:3] * x[2:3, :]
           + bf_t_ref[...])                                     # (H, TILE_N)
    h = jnp.tanh(pre)                                           # EUP

    # Per-atom energy head (output width 1) -> sublane reduce (XLU).
    e_atom = jnp.sum(h * w2, axis=0, keepdims=True) + b2_ref[...]   # (1, TILE_N)

    # Fused energy reduction: one partial sum per tile (lane reduce on XLU).
    # Padded atoms have nonzero energy (tanh(b_fused)@w2 + b2), so the last
    # tile masks them — but only when padding exists (static branch) and only
    # on the last tile (pl.when), keeping every other tile mask-free.
    if last_tile_valid == tile_n:
        e_tile_ref[...] = jnp.broadcast_to(jnp.sum(e_atom), (1, 1, 128))
    else:
        is_last = pl.program_id(0) == pl.num_programs(0) - 1

        @pl.when(is_last)
        def _():
            lane = jax.lax.broadcasted_iota(jnp.int32, (1, tile_n), 1)
            e_masked = jnp.where(lane < last_tile_valid, e_atom, 0.0)
            e_tile_ref[...] = jnp.broadcast_to(jnp.sum(e_masked), (1, 1, 128))

        @pl.when(jnp.logical_not(is_last))
        def _():
            e_tile_ref[...] = jnp.broadcast_to(jnp.sum(e_atom), (1, 1, 128))

    # forces = -dE/dx (analytic chain rule), with w2 already folded into v_t:
    #   dE/dx[c, n] = sum_h (Wf[c, h] * w2[h]) * (1 - h[h, n]^2)
    g = 1.0 - h * h                                             # (H, TILE_N)
    v_t = v_t_ref[...]                                          # (H, 3)
    # Direct row stores: no (3, TILE_N) concat / sublane relayout.
    forces_ref[0:1, :] = -jnp.sum(v_t[:, 0:1] * g, axis=0, keepdims=True)
    forces_ref[1:2, :] = -jnp.sum(v_t[:, 1:2] * g, axis=0, keepdims=True)
    forces_ref[2:3, :] = -jnp.sum(v_t[:, 2:3] * g, axis=0, keepdims=True)


def _round_up(x, m):
    return ((x + m - 1) // m) * m


def _choose_tile(n_atoms):
    """Pick a lane-tile size.

    Small configs: single grid step (per-step overhead dominates the tiny
    per-tile workload).  Large configs: big tiles, but keep >= 2 tiles so the
    'parallel' grid axis can shard across both TensorCores on v7x.
    """
    n_lanes = _round_up(max(n_atoms, 1), 128)
    if n_lanes <= 2048:
        return n_lanes
    return min(4096, _round_up(pl.cdiv(n_lanes, 2), 128))


def training_wheels_forward(coords, params, *, tile_n=None):
    """Returns dict(energy, forces, stress=None), matching TrainingWheels.forward."""
    wd, bd, w1, b1, w2, b2 = params
    n_atoms = coords.shape[0]

    # Fold the linear descriptor into the first MLP layer (static weights;
    # zero per-call cost, removes 2 of 5 matmuls and all (N, D) intermediates).
    w_fused = wd @ w1                 # (3, H)
    b_fused = bd @ w1 + b1            # (1, H)
    wf_t = w_fused.T                  # (H, 3)
    bf_t = b_fused.T                  # (H, 1)
    v_t = wf_t * w2                   # (H, 3)  force-path weights (w2 folded in)

    if tile_n is None:
        tile_n = _choose_tile(n_atoms)
    num_tiles = max(1, pl.cdiv(n_atoms, tile_n))
    n_pad = num_tiles * tile_n
    last_tile_valid = n_atoms - (num_tiles - 1) * tile_n

    # Lane-dense layout: atoms on the lane axis; single pad op (no zeros+set).
    coords_t = jnp.pad(coords.astype(jnp.float32).T,
                       ((0, 0), (0, n_pad - n_atoms)))

    kernel = functools.partial(training_wheels_kernel,
                               tile_n=tile_n,
                               last_tile_valid=last_tile_valid)

    e_partial, forces_t = pl.pallas_call(
        kernel,
        out_shape=(
            jax.ShapeDtypeStruct((num_tiles, 1, 128), jnp.float32),  # per-tile E
            jax.ShapeDtypeStruct((3, n_pad), jnp.float32),           # forces
        ),
        grid=(num_tiles,),
        in_specs=[
            pl.BlockSpec((3, tile_n), lambda i: (0, i)),   # coord tile
            pl.BlockSpec(wf_t.shape, lambda i: (0, 0)),    # resident weights
            pl.BlockSpec(bf_t.shape, lambda i: (0, 0)),
            pl.BlockSpec(w2.shape, lambda i: (0, 0)),
            pl.BlockSpec(b2.shape, lambda i: (0, 0)),
            pl.BlockSpec(v_t.shape, lambda i: (0, 0)),
        ],
        out_specs=(
            pl.BlockSpec((1, 1, 128), lambda i: (i, 0, 0)),  # per-tile partial E
            pl.BlockSpec((3, tile_n), lambda i: (0, i)),     # forces tile
        ),
        compiler_params=pltpu.CompilerParams(
            # Atom tiles are independent -> both TensorCores on v7x; harmless
            # on single-TC v5e/v6e (grid is just a loop there).
            dimension_semantics=("parallel",),
        ),
    )(coords_t, wf_t, bf_t, w2, b2, v_t)

    energy = jnp.sum(e_partial[:, 0, 0])       # num_tiles scalars
    forces = forces_t[:, :n_atoms].T            # slice padded lanes, then (N, 3)
    return {"energy": energy, "forces": forces, "stress": None}


def _reference_forward(coords, params):
    """Pure-JAX reference reproducing the PyTorch semantics (autograd forces)."""
    wd, bd, w1, b1, w2, b2 = params

    def energy_fn(x):
        desc = x @ wd + bd
        h = jnp.tanh(desc @ w1 + b1)
        e_atom = h @ w2 + b2
        return jnp.sum(e_atom)

    e = energy_fn(coords)
    g = jax.grad(energy_fn)(coords)
    return {"energy": e, "forces": -g, "stress": None}


def _init_params(key, descriptor_dim=32, hidden_dim=32):
    k1, k2, k3 = jax.random.split(key, 3)
    wd = 0.5 * jax.random.normal(k1, (3, descriptor_dim), dtype=jnp.float32)
    bd = jnp.zeros((1, descriptor_dim), dtype=jnp.float32)
    w1 = 0.3 * jax.random.normal(k2, (descriptor_dim, hidden_dim), dtype=jnp.float32)
    b1 = jnp.full((1, hidden_dim), 0.01, dtype=jnp.float32)
    w2 = 0.3 * jax.random.normal(k3, (hidden_dim, 1), dtype=jnp.float32)
    b2 = jnp.zeros((1, 1), dtype=jnp.float32)
    return (wd, bd, w1, b1, w2, b2)


if __name__ == "__main__":
    key = jax.random.PRNGKey(0)
    k_coords, k_params = jax.random.split(key)
    params = _init_params(k_params)

    # Three cases: single padded tile, single exact tile (no-mask static path),
    # and a multi-tile config with a padded last tile (v7x dual-TC path).
    for n_atoms in (300, 256, 2500):
        coords = jax.random.normal(k_coords, (n_atoms, 3), dtype=jnp.float32)

        out = training_wheels_forward(coords, params)
        jax.block_until_ready(out["energy"])
        jax.block_until_ready(out["forces"])

        ref = _reference_forward(coords, params)
        assert jnp.allclose(out["energy"], ref["energy"], rtol=1e-4, atol=1e-2), n_atoms
        assert jnp.allclose(out["forces"], ref["forces"], rtol=1e-4, atol=1e-4), n_atoms
        assert out["stress"] is None

    print("KERNEL_OK")
</pallas_src>

<mosaic_0001>
module attributes {stable_mosaic.version = 11 : i64} {
  func.func @training_wheels_kernel(%arg0: i32, %arg1: memref<3x384xf32, #tpu.memory_space<vmem>>, %arg2: memref<32x3xf32, #tpu.memory_space<vmem>>, %arg3: memref<32x1xf32, #tpu.memory_space<vmem>>, %arg4: memref<32x1xf32, #tpu.memory_space<vmem>>, %arg5: memref<1x1xf32, #tpu.memory_space<vmem>>, %arg6: memref<32x3xf32, #tpu.memory_space<vmem>>, %arg7: memref<1x1x128xf32, #tpu.memory_space<vmem>>, %arg8: memref<3x384xf32, #tpu.memory_space<vmem>>) attributes {dimension_semantics = [#tpu.dimension_semantics<parallel>], iteration_bounds = array<i64: 1>, scalar_prefetch = 0 : i64, scratch_operands = 0 : i64, tpu.core_type = #tpu.core_type<tc>, window_params = [{transform_indices = @transform_0, window_bounds = array<i64: 3, 384>}, {pipeline_mode = #tpu.pipeline_mode<synchronous>, transform_indices = @transform_1, window_bounds = array<i64: 32, 3>}, {pipeline_mode = #tpu.pipeline_mode<synchronous>, transform_indices = @transform_2, window_bounds = array<i64: 32, 1>}, {pipeline_mode = #tpu.pipeline_mode<synchronous>, transform_indices = @transform_3, window_bounds = array<i64: 32, 1>}, {pipeline_mode = #tpu.pipeline_mode<synchronous>, transform_indices = @transform_4, window_bounds = array<i64: 1, 1>}, {pipeline_mode = #tpu.pipeline_mode<synchronous>, transform_indices = @transform_5, window_bounds = array<i64: 32, 3>}, {transform_indices = @transform_6, window_bounds = array<i64: 1, 1, 128>}, {transform_indices = @transform_7, window_bounds = array<i64: 3, 384>}]} {
    %c0 = arith.constant 0 : index
    %c0_0 = arith.constant 0 : index
    %0 = vector.load %arg1[%c0, %c0_0] : memref<3x384xf32, #tpu.memory_space<vmem>>, vector<3x384xf32>
    %c0_1 = arith.constant 0 : index
    %c0_2 = arith.constant 0 : index
    %1 = vector.load %arg2[%c0_1, %c0_2] : memref<32x3xf32, #tpu.memory_space<vmem>>, vector<32x3xf32>
    %c0_3 = arith.constant 0 : index
    %c0_4 = arith.constant 0 : index
    %2 = vector.load %arg4[%c0_3, %c0_4] : memref<32x1xf32, #tpu.memory_space<vmem>>, vector<32x1xf32>
    %3 = vector.extract_strided_slice %1 {offsets = [0, 0], sizes = [32, 1], strides = [1, 1]} : vector<32x3xf32> to vector<32x1xf32>
    %4 = vector.extract_strided_slice %0 {offsets = [0, 0], sizes = [1, 384], strides = [1, 1]} : vector<3x384xf32> to vector<1x384xf32>
    %5 = vector.broadcast %3 : vector<32x1xf32> to vector<32x384xf32>
    %6 = vector.broadcast %4 : vector<1x384xf32> to vector<32x384xf32>
    %7 = arith.mulf %5, %6 : vector<32x384xf32>
    %8 = vector.extract_strided_slice %1 {offsets = [0, 1], sizes = [32, 1], strides = [1, 1]} : vector<32x3xf32> to vector<32x1xf32>
    %9 = vector.extract_strided_slice %0 {offsets = [1, 0], sizes = [1, 384], strides = [1, 1]} : vector<3x384xf32> to vector<1x384xf32>
    %10 = vector.broadcast %8 : vector<32x1xf32> to vector<32x384xf32>
    %11 = vector.broadcast %9 : vector<1x384xf32> to vector<32x384xf32>
    %12 = arith.mulf %10, %11 : vector<32x384xf32>
    %13 = arith.addf %7, %12 : vector<32x384xf32>
    %14 = vector.extract_strided_slice %1 {offsets = [0, 2], sizes = [32, 1], strides = [1, 1]} : vector<32x3xf32> to vector<32x1xf32>
    %15 = vector.extract_strided_slice %0 {offsets = [2, 0], sizes = [1, 384], strides = [1, 1]} : vector<3x384xf32> to vector<1x384xf32>
    %16 = vector.broadcast %14 : vector<32x1xf32> to vector<32x384xf32>
    %17 = vector.broadcast %15 : vector<1x384xf32> to vector<32x384xf32>
    %18 = arith.mulf %16, %17 : vector<32x384xf32>
    %19 = arith.addf %13, %18 : vector<32x384xf32>
    %c0_5 = arith.constant 0 : index
    %c0_6 = arith.constant 0 : index
    %20 = vector.load %arg3[%c0_5, %c0_6] : memref<32x1xf32, #tpu.memory_space<vmem>>, vector<32x1xf32>
    %21 = vector.broadcast %20 : vector<32x1xf32> to vector<32x384xf32>
    %22 = arith.addf %19, %21 : vector<32x384xf32>
    %23 = math.tanh %22 : vector<32x384xf32>
    %24 = vector.broadcast %2 : vector<32x1xf32> to vector<32x384xf32>
    %25 = arith.mulf %23, %24 : vector<32x384xf32>
    %cst = arith.constant dense<0.000000e+00> : vector<384xf32>
    %26 = vector.multi_reduction <add>, %25, %cst [0] : vector<32x384xf32> to vector<384xf32>
    %27 = vector.shape_cast %26 : vector<384xf32> to vector<1x384xf32>
    %c0_7 = arith.constant 0 : index
    %c0_8 = arith.constant 0 : index
    %28 = vector.load %arg5[%c0_7, %c0_8] : memref<1x1xf32, #tpu.memory_space<vmem>>, vector<1x1xf32>
    %29 = vector.broadcast %28 : vector<1x1xf32> to vector<1x384xf32>
    %30 = arith.addf %27, %29 : vector<1x384xf32>
    %c0_i32 = arith.constant 0 : i32
    %31 = arith.cmpi eq, %arg0, %c0_i32 : i32
    %32 = arith.extui %31 : i1 to i32
    %c0_i32_9 = arith.constant 0 : i32
    %33 = arith.cmpi ne, %32, %c0_i32_9 : i32
    scf.if %33 {
      %65 = tpu.iota {dimensions = array<i32: 1>} : vector<1x384xi32>
      %c300_i32 = arith.constant 300 : i32
      %66 = vector.broadcast %c300_i32 : i32 to vector<1x384xi32>
      %67 = arith.cmpi slt, %65, %66 : vector<1x384xi32>
      %cst_24 = arith.constant 0.000000e+00 : f32
      %68 = vector.broadcast %cst_24 : f32 to vector<1x384xf32>
      %69 = arith.select %67, %30, %68 : vector<1x384xi1>, vector<1x384xf32>
      %70 = vector.shape_cast %69 : vector<1x384xf32> to vector<1x1x384xf32>
      %cst_25 = arith.constant dense<0.000000e+00> : vector<1xf32>
      %71 = vector.multi_reduction <add>, %70, %cst_25 [1, 2] : vector<1x1x384xf32> to vector<1xf32>
      %72 = vector.shape_cast %71 : vector<1xf32> to vector<1x1x1xf32>
      %73 = vector.extract %72[0, 0, 0] : f32 from vector<1x1x1xf32>
      %74 = vector.broadcast %73 : f32 to vector<1x1x128xf32>
      %c0_26 = arith.constant 0 : index
      %c0_27 = arith.constant 0 : index
      %c0_28 = arith.constant 0 : index
      %75 = vector.load %arg7[%c0_26, %c0_27, %c0_28] : memref<1x1x128xf32, #tpu.memory_space<vmem>>, vector<1x1x128xf32>
      tpu.vector_store %arg7[%c0_26, %c0_27, %c0_28], %74 {strides = array<i32>} : memref<1x1x128xf32, #tpu.memory_space<vmem>>, vector<1x1x128xf32>,
    } else {
    }
    %true = arith.constant true
    %34 = arith.xori %31, %true : i1
    %35 = arith.extui %34 : i1 to i32
    %c0_i32_10 = arith.constant 0 : i32
    %36 = arith.cmpi ne, %35, %c0_i32_10 : i32
    scf.if %36 {
      %65 = vector.shape_cast %30 : vector<1x384xf32> to vector<1x1x384xf32>
      %cst_24 = arith.constant dense<0.000000e+00> : vector<1xf32>
      %66 = vector.multi_reduction <add>, %65, %cst_24 [1, 2] : vector<1x1x384xf32> to vector<1xf32>
      %67 = vector.shape_cast %66 : vector<1xf32> to vector<1x1x1xf32>
      %68 = vector.extract %67[0, 0, 0] : f32 from vector<1x1x1xf32>
      %69 = vector.broadcast %68 : f32 to vector<1x1x128xf32>
      %c0_25 = arith.constant 0 : index
      %c0_26 = arith.constant 0 : index
      %c0_27 = arith.constant 0 : index
      %70 = vector.load %arg7[%c0_25, %c0_26, %c0_27] : memref<1x1x128xf32, #tpu.memory_space<vmem>>, vector<1x1x128xf32>
      tpu.vector_store %arg7[%c0_25, %c0_26, %c0_27], %69 {strides = array<i32>} : memref<1x1x128xf32, #tpu.memory_space<vmem>>, vector<1x1x128xf32>,
    } else {
    }
    %37 = arith.mulf %23, %23 : vector<32x384xf32>
    %cst_11 = arith.constant 1.000000e+00 : f32
    %38 = vector.broadcast %cst_11 : f32 to vector<32x384xf32>
    %39 = arith.subf %38, %37 : vector<32x384xf32>
    %c0_12 = arith.constant 0 : index
    %c0_13 = arith.constant 0 : index
    %40 = vector.load %arg6[%c0_12, %c0_13] : memref<32x3xf32, #tpu.memory_space<vmem>>, vector<32x3xf32>
    %41 = vector.extract_strided_slice %40 {offsets = [0, 0], sizes = [32, 1], strides = [1, 1]} : vector<32x3xf32> to vector<32x1xf32>
    %42 = vector.broadcast %41 : vector<32x1xf32> to vector<32x384xf32>
    %43 = arith.mulf %42, %39 : vector<32x384xf32>
    %cst_14 = arith.constant dense<0.000000e+00> : vector<384xf32>
    %44 = vector.multi_reduction <add>, %43, %cst_14 [0] : vector<32x384xf32> to vector<384xf32>
    %45 = vector.shape_cast %44 : vector<384xf32> to vector<1x384xf32>
    %cst_15 = arith.constant 0.000000e+00 : f32
    %46 = vector.broadcast %cst_15 : f32 to vector<1x384xf32>
    %47 = arith.subf %46, %45 : vector<1x384xf32>
    %c0_16 = arith.constant 0 : index
    %c0_17 = arith.constant 0 : index
    %48 = vector.load %arg8[%c0_16, %c0_17] : memref<3x384xf32, #tpu.memory_space<vmem>>, vector<1x384xf32>
    tpu.vector_store %arg8[%c0_16, %c0_17], %47 {strides = array<i32>} : memref<3x384xf32, #tpu.memory_space<vmem>>, vector<1x384xf32>,
    %49 = vector.extract_strided_slice %40 {offsets = [0, 1], sizes = [32, 1], strides = [1, 1]} : vector<32x3xf32> to vector<32x1xf32>
    %50 = vector.broadcast %49 : vector<32x1xf32> to vector<32x384xf32>
    %51 = arith.mulf %50, %39 : vector<32x384xf32>
    %cst_18 = arith.constant dense<0.000000e+00> : vector<384xf32>
    %52 = vector.multi_reduction <add>, %51, %cst_18 [0] : vector<32x384xf32> to vector<384xf32>
    %53 = vector.shape_cast %52 : vector<384xf32> to vector<1x384xf32>
    %cst_19 = arith.constant 0.000000e+00 : f32
    %54 = vector.broadcast %cst_19 : f32 to vector<1x384xf32>
    %55 = arith.subf %54, %53 : vector<1x384xf32>
    %c1 = arith.constant 1 : index
    %c0_20 = arith.constant 0 : index
    %56 = vector.load %arg8[%c1, %c0_20] : memref<3x384xf32, #tpu.memory_space<vmem>>, vector<1x384xf32>
    tpu.vector_store %arg8[%c1, %c0_20], %55 {strides = array<i32>} : memref<3x384xf32, #tpu.memory_space<vmem>>, vector<1x384xf32>,
    %57 = vector.extract_strided_slice %40 {offsets = [0, 2], sizes = [32, 1], strides = [1, 1]} : vector<32x3xf32> to vector<32x1xf32>
    %58 = vector.broadcast %57 : vector<32x1xf32> to vector<32x384xf32>
    %59 = arith.mulf %58, %39 : vector<32x384xf32>
    %cst_21 = arith.constant dense<0.000000e+00> : vector<384xf32>
    %60 = vector.multi_reduction <add>, %59, %cst_21 [0] : vector<32x384xf32> to vector<384xf32>
    %61 = vector.shape_cast %60 : vector<384xf32> to vector<1x384xf32>
    %cst_22 = arith.constant 0.000000e+00 : f32
    %62 = vector.broadcast %cst_22 : f32 to vector<1x384xf32>
    %63 = arith.subf %62, %61 : vector<1x384xf32>
    %c2 = arith.constant 2 : index
    %c0_23 = arith.constant 0 : index
    %64 = vector.load %arg8[%c2, %c0_23] : memref<3x384xf32, #tpu.memory_space<vmem>>, vector<1x384xf32>
    tpu.vector_store %arg8[%c2, %c0_23], %63 {strides = array<i32>} : memref<3x384xf32, #tpu.memory_space<vmem>>, vector<1x384xf32>,
    return
  }
  func.func @transform_0(%arg0: i32) -> (i32, i32) {
    %c0_i32 = arith.constant 0 : i32
    %c0_i32_0 = arith.constant 0 : i32
    return %c0_i32, %arg0 : i32, i32
  }
  func.func @transform_1(%arg0: i32) -> (i32, i32) {
    %c0_i32 = arith.constant 0 : i32
    %c0_i32_0 = arith.constant 0 : i32
    %c0_i32_1 = arith.constant 0 : i32
    return %c0_i32, %c0_i32_0 : i32, i32
  }
  func.func @transform_2(%arg0: i32) -> (i32, i32) {
    %c0_i32 = arith.constant 0 : i32
    %c0_i32_0 = arith.constant 0 : i32
    %c0_i32_1 = arith.constant 0 : i32
    return %c0_i32, %c0_i32_0 : i32, i32
  }
  func.func @transform_3(%arg0: i32) -> (i32, i32) {
    %c0_i32 = arith.constant 0 : i32
    %c0_i32_0 = arith.constant 0 : i32
    %c0_i32_1 = arith.constant 0 : i32
    return %c0_i32, %c0_i32_0 : i32, i32
  }
  func.func @transform_4(%arg0: i32) -> (i32, i32) {
    %c0_i32 = arith.constant 0 : i32
    %c0_i32_0 = arith.constant 0 : i32
    %c0_i32_1 = arith.constant 0 : i32
    return %c0_i32, %c0_i32_0 : i32, i32
  }
  func.func @transform_5(%arg0: i32) -> (i32, i32) {
    %c0_i32 = arith.constant 0 : i32
    %c0_i32_0 = arith.constant 0 : i32
    %c0_i32_1 = arith.constant 0 : i32
    return %c0_i32, %c0_i32_0 : i32, i32
  }
  func.func @transform_6(%arg0: i32) -> (i32, i32, i32) {
    %c0_i32 = arith.constant 0 : i32
    %c0_i32_0 = arith.constant 0 : i32
    %c0_i32_1 = arith.constant 0 : i32
    return %arg0, %c0_i32, %c0_i32_0 : i32, i32, i32
  }
  func.func @transform_7(%arg0: i32) -> (i32, i32) {
    %c0_i32 = arith.constant 0 : i32
    %c0_i32_0 = arith.constant 0 : i32
    return %c0_i32, %arg0 : i32, i32
  }
}

</mosaic_0001>

<bundles_post_ra>
// kernel: tpu_custom_call.1
= control target key start
LH: loop header
LB: loop body
LE: loop exit
PB: predicated region body
PF: predicated region fallthrough
CT: control target
= control target key end

     0   :  { %s989_s0 = inlined_call_operand.vmem [shape: f32[3,384], index: 0, kind: input, shape index: {}]   ;;  %s990_s1 = inlined_call_operand.vmem [shape: f32[32,3], index: 1, kind: input, shape index: {}]   ;;  %s991_s2 = inlined_call_operand.vmem [shape: f32[32,1], index: 2, kind: input, shape index: {}]   ;;  %s992_s3 = inlined_call_operand.vmem [shape: f32[32,1], index: 3, kind: input, shape index: {}]   ;;  %s993_s4 = inlined_call_operand.<no memory space> [shape: f32[1,1], index: 4, kind: input, shape index: {}]   ;;  %s994_s5 = inlined_call_operand.vmem [shape: f32[32,3], index: 5, kind: input, shape index: {}]   ;;  %s995_s6 = inlined_call_operand.hbm [shape: f32[1,1,128], index: 6, kind: output, shape index: {0}]   ;;  %s996_s7 = inlined_call_operand.hbm [shape: f32[3,384], index: 7, kind: output, shape index: {1}]  }
   0x1   :  { %v13_v0 = vstv %s993_s4 }
   0x2   :  { %14 = vst [vmem:[#allocation2] sm:$0x1] %v13_v0 }
   0x3   :  { %15 = vsyncpa [#allocation4], 0  ;;  %v33_v1 = vld [vmem:[%s990_s1 + $0x10] sm:$0xff]  ;;  %v31_v2 = vld [vmem:[%s990_s1] sm:$0xff]  ;;  %v727_v3 = vmov 1   ;;  %v728_v4 = vmov 0  }
   0x4   :  { %631 = vset.pattern.permute.xlu2 %v727_v3  ;;  %630 = vset.pattern.permute.xlu1 %v728_v4 }
   0x5   :  { %16 = vsyncpa [#allocation6], 0  ;;  %629 = vset.pattern.permute.xlu0 %v728_v4  ;;  %51 = vperm.xlu1 %630, %v33_v1   ;;  %v34_v5 = vld [vmem:[%s990_s1 + $0x18] sm:$0xff]  ;;  %v32_v6 = vld [vmem:[%s990_s1 + $0x8] sm:$0xff]  ;;  %v729_v7 = vmov 2   ;;  %vm311_vm0 = vcmask 1040384  }
   0x6   :  { %83 = vperm.xlu2 %631, %v31_v2   ;;  %41 = vperm.xlu0 %629, %v31_v2   ;;  %v181_v8 = vld [vmem:[%s991_s2 + $0x8] sm:$0xff]  ;;  %v180_v9 = vld [vmem:[%s991_s2] sm:$0xff]  ;;  %v183_v11 = vld [vmem:[%s991_s2 + $0x18] sm:$0xff]  ;;  %vm446_vm2 = vcmask 1041408   ;;  %s608_s12 = sshll.u32 %s996_s7, 4  ;;  %s731_s13 = smov [#allocation3]   ;;  %s609_s12 = int_to_ptr.hbm [resolvable:$true] %s608_s12 }
   0x7   :  { %v35_v10 = vld [vmem:[%s992_s3] sm:$0xff]  ;;  %v182_v12 = vld [vmem:[%s991_s2 + $0x10] sm:$0xff]  ;;  %v36_v14 = vld [vmem:[%s992_s3 + $0x8] sm:$0xff]  ;;  %s595_s14 = sshll.u32 %s731_s13, 4  ;;  %s597_s17 = sshll.u32 %s995_s6, 4  ;;  %s596_s14 = int_to_ptr.vmem [resolvable:$true] %s595_s14  ;;  %s598_s17 = int_to_ptr.hbm [resolvable:$true] %s597_s17 }
   0x8   :  { %v37_v13 = vld [vmem:[%s992_s3 + $0x10] sm:$0xff]  ;;  %v38_v16 = vld [vmem:[%s992_s3 + $0x18] sm:$0xff]  ;;  %v374_v17 = vld [vmem:[%s994_s5 + $0x8] sm:$0xff] }
   0x9   :  { %v287_v15 = vld [vmem:[#allocation2] sm:$0x1]  ;;  %v375_v20 = vld [vmem:[%s994_s5 + $0x10] sm:$0xff]  ;;  %v376_v22 = vld [vmem:[%s994_s5 + $0x18] sm:$0xff] }
   0xa   :  { %v373_v18 = vld [vmem:[%s994_s5] sm:$0xff]  ;;  %v30_v30 = vld [vmem:[%s989_s0 + $0x8] sm:$0x7] }
   0xb   :  { %v29_v29 = vld [vmem:[%s989_s0] sm:$0x77]  ;;  %v100_v33 = vperm.slane %v30_v30, 1  ;;  %v63_v39 = vperm.slane %v30_v30, 0  ;;  %v149_v43 = vperm.slane %v30_v30, 2  ;;  %s730_s0 = smov [#allocation5]  }
   0xc   :  { %v98_v31 = vperm.slane %v29_v29, 1  ;;  %v99_v32 = vperm.slane %v29_v29, 5  ;;  %v147_v36 = vperm.slane %v29_v29, 2  ;;  %v61_v37 = vperm.slane %v29_v29, 0  ;;  %s606_s10 = sshll.u32 %s730_s0, 4  ;;  %s607_s10 = int_to_ptr.vmem [resolvable:$true] %s606_s10 }
   0xd   :  { %56 = vperm.xlu1 %630, %v34_v5   ;;  %v62_v38 = vperm.slane %v29_v29, 4  ;;  %v148_v42 = vperm.slane %v29_v29, 6  ;;  %v106_v44 = vperm.slane %v100_v33, 1  ;;  %v69_v49 = vperm.slane %v63_v39, 0 }
   0xe   :  { %87 = vperm.xlu2 %631, %v32_v6   ;;  %46 = vperm.xlu0 %629, %v32_v6   ;;  %v104_v40 = vperm.slane %v98_v31, 1  ;;  %v105_v41 = vperm.slane %v99_v32, 1  ;;  %v153_v46 = vperm.slane %v147_v36, 2  ;;  %v67_v47 = vperm.slane %v61_v37, 0 }
   0xf   :  { %v68_v48 = vperm.slane %v62_v38, 0  ;;  %v154_v52 = vperm.slane %v148_v42, 2  ;;  %v851_v53 = vperm.slane %v149_v43, 2 }
  0x15   :  { %633 = vset.pattern.permute.xlu1 %v729_v7 }
  0x16   :  { %634 = vset.pattern.permute.xlu2 %v729_v7  ;;  %632 = vset.pattern.permute.xlu0 %v727_v3 }
  0x17   :  { %132 = vperm.xlu1 %633, %v31_v2   ;;  %136 = vperm.xlu2 %634, %v32_v6  }
  0x18   :  { %91 = vperm.xlu0 %632, %v33_v1  }
  0x1f   :  { %635 = vset.pattern.permute.xlu1 %v727_v3  ;;  %140 = vperm.xlu2 %634, %v33_v1  }
  0x20   :  { %95 = vperm.xlu1 %635, %v34_v5   ;;  %636 = vset.pattern.permute.xlu0 %v729_v7 }
  0x21   :  { %144 = vperm.xlu0 %636, %v34_v5  }
  0x27   :  { %638 = vset.pattern.permute.xlu2 %v728_v4 }
  0x28   :  { %637 = vset.pattern.permute.xlu1 %v728_v4  ;;  %191 = vperm.xlu2 %638, %v181_v8  }
  0x29   :  { %186 = vperm.xlu1 %637, %v180_v9   ;;  %639 = vset.pattern.permute.xlu0 %v728_v4 }
  0x2a   :  { %230 = vperm.xlu0 %639, %v35_v10  }
  0x30   :  { %201 = vperm.xlu2 %638, %v183_v11  }
  0x31   :  { %196 = vperm.xlu1 %637, %v182_v12  }
  0x32   :  { %650 = vset.pattern.permute.xlu0 %v729_v7 }
  0x38   :  { %240 = vperm.xlu2 %638, %v37_v13  }
  0x39   :  { %235 = vperm.xlu1 %637, %v36_v14  }
  0x40   :  { %290 = vperm.xlu2 %638, %v287_v15  }
  0x41   :  { %245 = vperm.xlu1 %637, %v38_v16  }
  0x48   :  { %384 = vperm.xlu2 %638, %v374_v17  }
  0x49   :  { %379 = vperm.xlu1 %637, %v373_v18  }
  0x50   :  { %641 = vset.pattern.permute.xlu2 %v727_v3 }
  0x51   :  { %640 = vset.pattern.permute.xlu1 %v727_v3  ;;  %459 = vperm.xlu2 %641, %v374_v17  }
  0x52   :  { %455 = vperm.xlu1 %640, %v373_v18  }
  0x59   :  { %643 = vset.pattern.permute.xlu2 %v729_v7 }
  0x5a   :  { %642 = vset.pattern.permute.xlu1 %v729_v7  ;;  %527 = vperm.xlu2 %643, %v374_v17  }
  0x5b   :  { %523 = vperm.xlu1 %642, %v373_v18  }
  0x60   :  { %v827_v19 = vpop.permute.xlu2 %83 }
  0x61   :  { %v107_v59 = vmul.f32 %v104_v40, %v827_v19  ;;  %v109_v6 = vmul.f32 %v106_v44, %v827_v19 }
  0x62   :  { %645 = vset.pattern.permute.xlu2 %v727_v3 }
  0x63   :  { %644 = vset.pattern.permute.xlu1 %v728_v4  ;;  %463 = vperm.xlu2 %645, %v375_v20  }
  0x64   :  { %389 = vperm.xlu1 %644, %v375_v20  }
  0x68   :  { %v88_v21 = vpop.permute.xlu2 %87 }
  0x69   :  { %v110_v50 = vmul.f32 %v104_v40, %v88_v21  ;;  %v111_v51 = vmul.f32 %v105_v41, %v88_v21  ;;  %v112_v54 = vmul.f32 %v106_v44, %v88_v21 }
  0x6b   :  { %647 = vset.pattern.permute.xlu2 %v728_v4  ;;  %v108_v4 = vmul.f32 %v105_v41, %v827_v19 }
  0x6c   :  { %646 = vset.pattern.permute.xlu1 %v729_v7  ;;  %394 = vperm.xlu2 %647, %v376_v22  }
  0x6d   :  { %531 = vperm.xlu1 %646, %v375_v20  }
  0x71   :  { %v137_v23 = vpop.permute.xlu2 %136 }
  0x72   :  { %v159_v60 = vmul.f32 %v153_v46, %v137_v23  ;;  %v160_v61 = vmul.f32 %v154_v52, %v137_v23  ;;  %v161_v62 = vmul.f32 %v851_v53, %v137_v23 }
  0x74   :  { %649 = vset.pattern.permute.xlu2 %v729_v7 }
  0x75   :  { %648 = vset.pattern.permute.xlu1 %v727_v3  ;;  %535 = vperm.xlu2 %649, %v376_v22  }
  0x76   :  { %467 = vperm.xlu1 %648, %v376_v22  }
  0x77   :  { %v52_v24 = vpop.permute.xlu1 %51 }
  0x78   :  { %v42_v26 = vpop.permute.xlu0 %41  ;;  %v76_v7 = vmul.f32 %v67_v47, %v52_v24  ;;  %v77_v8 = vmul.f32 %v68_v48, %v52_v24  ;;  %v78_v10 = vmul.f32 %v69_v49, %v52_v24 }
  0x79   :  { %v141_v25 = vpop.permute.xlu2 %140  ;;  %v70_v0 = vmul.f32 %v67_v47, %v42_v26  ;;  %v71_v5 = vmul.f32 %v68_v48, %v42_v26  ;;  %v72_v9 = vmul.f32 %v69_v49, %v42_v26 }
  0x7a   :  { %v162_v11 = vmul.f32 %v153_v46, %v141_v25  ;;  %v163_v12 = vmul.f32 %v154_v52, %v141_v25  ;;  %v164_v13 = vmul.f32 %v851_v53, %v141_v25 }
  0x7b   :  { %v119_v15 = vadd.f32 %v107_v59, %v70_v0  ;;  %v120_v20 = vadd.f32 %v108_v4, %v71_v5  ;;  %v121_v19 = vadd.f32 %v109_v6, %v72_v9 }
  0x7f   :  { %v839_v27 = vpop.permute.xlu1 %56 }
  0x80   :  { %v47_v34 = vpop.permute.xlu0 %46  ;;  %v79_v24 = vmul.f32 %v67_v47, %v839_v27  ;;  %v80_v31 = vmul.f32 %v68_v48, %v839_v27  ;;  %v81_v36 = vmul.f32 %v69_v49, %v839_v27 }
  0x81   :  { %v73_v55 = vmul.f32 %v67_v47, %v47_v34  ;;  %v74_v56 = vmul.f32 %v68_v48, %v47_v34  ;;  %v75_v57 = vmul.f32 %v69_v49, %v47_v34 }
  0x82   :  { %v841_v28 = vpop.permute.xlu2 %191 }
  0x83   :  { %v122_v1 = vadd.f32 %v110_v50, %v73_v55  ;;  %v123_v2 = vadd.f32 %v111_v51, %v74_v56  ;;  %v124_v3 = vadd.f32 %v112_v54, %v75_v57 }
  0x85   :  { %v171_v16 = vadd.f32 %v159_v60, %v122_v1  ;;  %v172_v17 = vadd.f32 %v160_v61, %v123_v2  ;;  %v173_v18 = vadd.f32 %v161_v62, %v124_v3 }
  0x87   :  { %v207_v37 = vadd.f32 %v841_v28, %v171_v16  ;;  %v208_v38 = vadd.f32 %v841_v28, %v172_v17 }
  0x89   :  { %v133_v35 = vpop.permute.xlu1 %132  ;;  %651 = vtanh.f32 %v207_v37 }
  0x8a   :  { %v849_v45 = vpop.permute.xlu2 %201  ;;  %v92_v63 = vpop.permute.xlu0 %91  ;;  %v156_v21 = vmul.f32 %v153_v46, %v133_v35  ;;  %v157_v22 = vmul.f32 %v154_v52, %v133_v35  ;;  %v158_v23 = vmul.f32 %v851_v53, %v133_v35  ;;  %v209_v35 = vadd.f32 %v841_v28, %v173_v18 }
  0x8b   :  { %v113_v29 = vmul.f32 %v104_v40, %v92_v63  ;;  %v114_v30 = vmul.f32 %v105_v41, %v92_v63  ;;  %v115_v26 = vmul.f32 %v106_v44, %v92_v63  ;;  %653 = vtanh.f32 %v208_v38 }
  0x8c   :  { %v168_v42 = vadd.f32 %v156_v21, %v119_v15  ;;  %v169_v43 = vadd.f32 %v157_v22, %v120_v20  ;;  %v170_v50 = vadd.f32 %v158_v23, %v121_v19  ;;  %655 = vtanh.f32 %v209_v35 }
  0x8d   :  { %v125_v51 = vadd.f32 %v113_v29, %v76_v7  ;;  %v126_v47 = vadd.f32 %v114_v30, %v77_v8  ;;  %v127_v54 = vadd.f32 %v115_v26, %v78_v10 }
  0x8f   :  { %v176_v60 = vadd.f32 %v164_v13, %v127_v54  ;;  %v870_v2 = vpop.eup %651 }
  0x92   :  { %v96_v58 = vpop.permute.xlu1 %95  ;;  %v858_v14 = vpop.permute.xlu2 %240 }
  0x93   :  { %v116_v25 = vmul.f32 %v104_v40, %v96_v58  ;;  %v117_v32 = vmul.f32 %v105_v41, %v96_v58  ;;  %v145_v33 = vpop.permute.xlu0 %144  ;;  %v118_v39 = vmul.f32 %v106_v44, %v96_v58  ;;  %v174_v44 = vadd.f32 %v162_v11, %v125_v51 }
  0x94   :  { %v165_v48 = vmul.f32 %v153_v46, %v145_v33  ;;  %v166_v55 = vmul.f32 %v154_v52, %v145_v33  ;;  %v167_v57 = vmul.f32 %v851_v53, %v145_v33  ;;  %v175_v58 = vadd.f32 %v163_v12, %v126_v47  ;;  %v872_v53 = vpop.eup %653 }
  0x95   :  { %v128_v40 = vadd.f32 %v116_v25, %v79_v24  ;;  %v129_v41 = vadd.f32 %v117_v32, %v80_v31  ;;  %v130_v49 = vadd.f32 %v118_v39, %v81_v36  ;;  %v875_v4 = vpop.eup %655 }
  0x97   :  { %v177_v61 = vadd.f32 %v165_v48, %v128_v40  ;;  %v178_v62 = vadd.f32 %v166_v55, %v129_v41  ;;  %v179_v1 = vadd.f32 %v167_v57, %v130_v49  ;;  %v301_v40 = vlaneseq }
  0x99   :  { %v213_v3 = vadd.f32 %v849_v45, %v177_v61  ;;  %v214_v5 = vadd.f32 %v849_v45, %v178_v62  ;;  %v215_v7 = vadd.f32 %v849_v45, %v179_v1  ;;  %vm967_vm3 = vcmp.lt.s32.totalorder %v301_v40, 384 }
  0x9a   :  { %v868_v59 = vpop.permute.xlu2 %290 }
  0x9b   :  { %v187_v34 = vpop.permute.xlu1 %186 }
  0x9c   :  { %v204_v56 = vadd.f32 %v187_v34, %v168_v42  ;;  %v205_v27 = vadd.f32 %v187_v34, %v169_v43  ;;  %v206_v28 = vadd.f32 %v187_v34, %v170_v50  ;;  %v231_v9 = vpop.permute.xlu0 %230 }
  0x9e   :  { %657 = vtanh.f32 %v204_v56 }
  0x9f   :  { %659 = vtanh.f32 %v205_v27 }
  0xa0   :  { %661 = vtanh.f32 %v206_v28  ;;  %v302_v28 = vand.u32 127, %v301_v40 }
  0xa2   :  { %v885_v11 = vpop.permute.xlu2 %384 }
  0xa3   :  { %v197_v46 = vpop.permute.xlu1 %196 }
  0xa4   :  { %v210_v52 = vadd.f32 %v197_v46, %v174_v44  ;;  %v211_v63 = vadd.f32 %v197_v46, %v175_v58  ;;  %v212_v0 = vadd.f32 %v197_v46, %v176_v60  ;;  %v878_v6 = vpop.eup %657 }
  0xa5   :  { %v881_v8 = vpop.eup %659  ;;  %v248_v45 = vmul.f32 %v878_v6, %v231_v9 }
  0xa6   :  { %663 = vtanh.f32 %v210_v52  ;;  %v883_v10 = vpop.eup %661  ;;  %v249_v20 = vmul.f32 %v881_v8, %v231_v9  ;;  %v304_v52 = vadd.s32 256, %v302_v28 }
  0xa7   :  { %665 = vtanh.f32 %v211_v63  ;;  %v250_v22 = vmul.f32 %v883_v10, %v231_v9  ;;  %v293_v63 = vperm.slane %v868_v59, 0 }
  0xa8   :  { %667 = vtanh.f32 %v212_v0  ;;  %vm307_vm1 = vcmp.lt.s32.totalorder %v304_v52, 300 }
  0xa9   :  { %669 = vtanh.f32 %v213_v3 }
  0xaa   :  { %671 = vtanh.f32 %v214_v5 }
  0xab   :  { %v236_v12 = vpop.permute.xlu1 %235  ;;  %673 = vtanh.f32 %v215_v7  ;;  %v905_v42 = vpop.permute.xlu2 %459 }
  0xac   :  { %v887_v13 = vpop.eup %663  ;;  %v251_v15 = vmul.f32 %v870_v2, %v236_v12  ;;  %v252_v16 = vmul.f32 %v872_v53, %v236_v12  ;;  %v253_v17 = vmul.f32 %v875_v4, %v236_v12 }
  0xad   :  { %v892_v18 = vpop.eup %665  ;;  %v254_v29 = vmul.f32 %v887_v13, %v858_v14 }
  0xae   :  { %v896_v21 = vpop.eup %667  ;;  %v260_v23 = vadd.f32 %v251_v15, %v248_v45  ;;  %v269_v19 = vadd.f32 %v252_v16, %v249_v20  ;;  %v255_v30 = vmul.f32 %v892_v18, %v858_v14  ;;  %v278_v26 = vadd.f32 %v253_v17, %v250_v22 }
  0xaf   :  { %v256_v24 = vmul.f32 %v896_v21, %v858_v14  ;;  %v670_v31 = vpop.eup %669 }
  0xb0   :  { %v672_v25 = vpop.eup %671  ;;  %v261_v34 = vadd.f32 %v260_v23, %v254_v29  ;;  %v270_v36 = vadd.f32 %v269_v19, %v255_v30  ;;  %v352_v19 = vmul.f32 %v870_v2, %v870_v2  ;;  %v349_v29 = vmul.f32 %v878_v6, %v878_v6 }
  0xb1   :  { %v674_v32 = vpop.eup %673  ;;  %v279_v39 = vadd.f32 %v278_v26, %v256_v24  ;;  %v350_v30 = vmul.f32 %v881_v8, %v881_v8  ;;  %v351_v26 = vmul.f32 %v883_v10, %v883_v10  ;;  %v355_v8 = vmul.f32 %v887_v13, %v887_v13 }
  0xb2   :  { %v361_v2 = vsub.f32 1.0, %v349_v29  ;;  %v360_v6 = vmul.f32 %v674_v32, %v674_v32  ;;  %v356_v10 = vmul.f32 %v892_v18, %v892_v18 }
  0xb3   :  { %v246_v33 = vpop.permute.xlu1 %245  ;;  %v367_v18 = vsub.f32 1.0, %v355_v8 }
  0xb4   :  { %v257_v37 = vmul.f32 %v670_v31, %v246_v33  ;;  %v258_v38 = vmul.f32 %v672_v25, %v246_v33  ;;  %v259_v35 = vmul.f32 %v674_v32, %v246_v33  ;;  %v908_v60 = vpop.permute.xlu2 %527  ;;  %v353_v33 = vmul.f32 %v872_v53, %v872_v53 }
  0xb6   :  { %v262_v43 = vadd.f32 %v261_v34, %v257_v37  ;;  %v271_v50 = vadd.f32 %v270_v36, %v258_v38  ;;  %v280_v51 = vadd.f32 %v279_v39, %v259_v35  ;;  %v354_v34 = vmul.f32 %v875_v4, %v875_v4 }
  0xb7   :  { %v364_v36 = vsub.f32 1.0, %v352_v19  ;;  %v358_v37 = vmul.f32 %v670_v31, %v670_v31  ;;  %v362_v38 = vsub.f32 1.0, %v350_v30  ;;  %v359_v35 = vmul.f32 %v672_v25, %v672_v25 }
  0xb8   :  { %v263_v47 = vrot.slane %v262_v43, 4  ;;  %v272_v54 = vrot.slane %v271_v50, 4  ;;  %v281_v48 = vrot.slane %v280_v51, 4  ;;  %v363_v39 = vsub.f32 1.0, %v351_v26 }
  0xb9   :  { %v365_v53 = vsub.f32 1.0, %v353_v33  ;;  %v400_v31 = vmul.f32 %v885_v11, %v364_v36  ;;  %v941_v13 = vsub.f32 1.0, %v359_v35 }
  0xba   :  { %v264_v14 = vadd.f32 %v263_v47, %v262_v43  ;;  %v273_v41 = vadd.f32 %v272_v54, %v271_v50  ;;  %v282_v55 = vadd.f32 %v281_v48, %v280_v51  ;;  %v357_v43 = vmul.f32 %v896_v21, %v896_v21 }
  0xbb   :  { %v380_v56 = vpop.permute.xlu1 %379  ;;  %v366_v50 = vsub.f32 1.0, %v354_v34  ;;  %v401_v25 = vmul.f32 %v885_v11, %v365_v53  ;;  %v939_v48 = vsub.f32 1.0, %v358_v37  ;;  %v943_v21 = vsub.f32 1.0, %v360_v6 }
  0xbc   :  { %v265_v27 = vrot.slane %v264_v14, 2  ;;  %v274_v49 = vrot.slane %v273_v41, 2  ;;  %v283_v57 = vrot.slane %v282_v55, 2  ;;  %v397_v51 = vmul.f32 %v380_v56, %v361_v2 }
  0xbd   :  { %v915_v22 = vpop.permute.xlu2 %463  ;;  %v398_v4 = vmul.f32 %v380_v56, %v362_v38  ;;  %v399_v47 = vmul.f32 %v380_v56, %v363_v39  ;;  %v402_v32 = vmul.f32 %v885_v11, %v366_v50 }
  0xbe   :  { %v266_v44 = vadd.f32 %v265_v27, %v264_v14  ;;  %v275_v58 = vadd.f32 %v274_v49, %v273_v41  ;;  %v284_v46 = vadd.f32 %v283_v57, %v282_v55  ;;  %v368_v14 = vsub.f32 1.0, %v356_v10 }
  0xbf   :  { %v369_v41 = vsub.f32 1.0, %v357_v43  ;;  %v473_v55 = vmul.f32 %v905_v42, %v364_v36  ;;  %v474_v27 = vmul.f32 %v905_v42, %v365_v53  ;;  %v409_v49 = vadd.f32 %v400_v31, %v397_v51 }
  0xc0   :  { %v267_v61 = vrot.slane %v266_v44, 1  ;;  %v276_v62 = vrot.slane %v275_v58, 1  ;;  %v285_v3 = vrot.slane %v284_v46, 1  ;;  %v418_v56 = vadd.f32 %v401_v25, %v398_v4 }
  0xc1   :  { %v427_v28 = vadd.f32 %v402_v32, %v399_v47  ;;  %v477_v19 = vmul.f32 %v915_v22, %v368_v14 }
  0xc2   :  { %v268_v0 = vadd.f32 %v267_v61, %v266_v44  ;;  %v277_v1 = vadd.f32 %v276_v62, %v275_v58  ;;  %v286_v7 = vadd.f32 %v285_v3, %v284_v46  ;;  %v475_v61 = vmul.f32 %v905_v42, %v366_v50 }
  0xc3   :  { %v541_v62 = vmul.f32 %v908_v60, %v364_v36 }
  0xc4   :  { %v911_v5 = vpop.permute.xlu1 %455  ;;  %v294_v9 = vadd.f32 %v293_v63, %v268_v0  ;;  %v295_v12 = vadd.f32 %v293_v63, %v277_v1  ;;  %v296_v15 = vadd.f32 %v293_v63, %v286_v7 }
  0xc5   :  { %v470_v7 = vmul.f32 %v911_v5, %v361_v2  ;;  %v472_v29 = vmul.f32 %v911_v5, %v363_v39 }
  0xc6   :  { %v312_v16 = vsel %vm311_vm0, %v294_v9, 0.0  ;;  %v313_v17 = vsel %vm311_vm0, %v295_v12, 0.0  ;;  %v310_v45 = vsel %vm307_vm1, %v296_v15, 0.0  ;;  %v395_v54 = vpop.permute.xlu2 %394  ;;  %v471_v9 = vmul.f32 %v911_v5, %v362_v38 }
  0xc7   :  { %v314_v20 = vadd.f32 %v313_v17, %v312_v16  ;;  %v315_v59 = vsel %vm311_vm0, %v310_v45, 0.0  ;;  %v406_v46 = vmul.f32 %v395_v54, %v939_v48  ;;  %v407_v52 = vmul.f32 %v395_v54, %v941_v13 }
  0xc8   :  { %v408_v63 = vmul.f32 %v395_v54, %v943_v21  ;;  %v482_v36 = vadd.f32 %v473_v55, %v470_v7  ;;  %v491_v37 = vadd.f32 %v474_v27, %v471_v9  ;;  %v500_v32 = vadd.f32 %v475_v61, %v472_v29 }
  0xc9   :  { %v316_v23 = vadd.f32 %v315_v59, %v314_v20  ;;  %v542_v20 = vmul.f32 %v908_v60, %v365_v53  ;;  %v543_v59 = vmul.f32 %v908_v60, %v366_v50 }
  0xcb   :  { %317 = vadd.xlane.f32.xlu0 %v316_v23  ;;  %v476_v23 = vmul.f32 %v915_v22, %v367_v18 }
  0xcd   :  { %v524_v24 = vpop.permute.xlu1 %523 }
  0xce   :  { %v538_v12 = vmul.f32 %v524_v24, %v361_v2  ;;  %v539_v15 = vmul.f32 %v524_v24, %v362_v38  ;;  %v540_v16 = vmul.f32 %v524_v24, %v363_v39 }
  0xcf   :  { %v536_v30 = vpop.permute.xlu2 %535 }
  0xd0   :  { %v550_v24 = vadd.f32 %v541_v62, %v538_v12  ;;  %v559_v2 = vadd.f32 %v542_v20, %v539_v15  ;;  %v568_v38 = vadd.f32 %v543_v59, %v540_v16  ;;  %v547_v60 = vmul.f32 %v536_v30, %v939_v48 }
  0xd1   :  { %v548_v5 = vmul.f32 %v536_v30, %v941_v13  ;;  %v549_v31 = vmul.f32 %v536_v30, %v943_v21 }
  0xd6   :  { %v390_v57 = vpop.permute.xlu1 %389 }
  0xd7   :  { %v403_v44 = vmul.f32 %v390_v57, %v367_v18  ;;  %v404_v58 = vmul.f32 %v390_v57, %v368_v14  ;;  %v405_v11 = vmul.f32 %v390_v57, %v369_v41 }
  0xd9   :  { %v410_v0 = vadd.f32 %v409_v49, %v403_v44  ;;  %v419_v1 = vadd.f32 %v418_v56, %v404_v58  ;;  %v428_v3 = vadd.f32 %v427_v28, %v405_v11  ;;  %v478_v56 = vmul.f32 %v915_v22, %v369_v41 }
  0xda   :  { %v483_v11 = vadd.f32 %v482_v36, %v476_v23 }
  0xdb   :  { %v411_v17 = vadd.f32 %v410_v0, %v406_v46  ;;  %v420_v42 = vadd.f32 %v419_v1, %v407_v52  ;;  %v429_v45 = vadd.f32 %v428_v3, %v408_v63  ;;  %v492_v63 = vadd.f32 %v491_v37, %v477_v19 }
  0xdc   :  { %v501_v61 = vadd.f32 %v500_v32, %v478_v56 }
  0xdd   :  { %v412_v26 = vrot.slane %v411_v17, 4  ;;  %v421_v33 = vrot.slane %v420_v42, 4  ;;  %v430_v34 = vrot.slane %v429_v45, 4 }
  0xdf   :  { %v413_v35 = vadd.f32 %v412_v26, %v411_v17  ;;  %v422_v6 = vadd.f32 %v421_v33, %v420_v42  ;;  %v431_v8 = vadd.f32 %v430_v34, %v429_v45  ;;  %v532_v10 = vpop.permute.xlu1 %531 }
  0xe0   :  { %v544_v43 = vmul.f32 %v532_v10, %v367_v18  ;;  %v545_v53 = vmul.f32 %v532_v10, %v368_v14  ;;  %v546_v50 = vmul.f32 %v532_v10, %v369_v41 }
  0xe1   :  { %v414_v39 = vrot.slane %v413_v35, 2  ;;  %v423_v51 = vrot.slane %v422_v6, 2  ;;  %v432_v4 = vrot.slane %v431_v8, 2 }
  0xe2   :  { %v551_v47 = vadd.f32 %v550_v24, %v544_v43  ;;  %v560_v54 = vadd.f32 %v559_v2, %v545_v53  ;;  %v569_v25 = vadd.f32 %v568_v38, %v546_v50 }
  0xe3   :  { %v415_v55 = vadd.f32 %v414_v39, %v413_v35  ;;  %v424_v27 = vadd.f32 %v423_v51, %v422_v6  ;;  %v433_v49 = vadd.f32 %v432_v4, %v431_v8 }
  0xe4   :  { %v552_v57 = vadd.f32 %v551_v47, %v547_v60  ;;  %v561_v18 = vadd.f32 %v560_v54, %v548_v5  ;;  %v570_v14 = vadd.f32 %v569_v25, %v549_v31 }
  0xe5   :  { %v416_v28 = vrot.slane %v415_v55, 1  ;;  %v425_v44 = vrot.slane %v424_v27, 1  ;;  %v434_v58 = vrot.slane %v433_v49, 1 }
  0xe6   :  { %v553_v62 = vrot.slane %v552_v57, 4  ;;  %v562_v46 = vrot.slane %v561_v18, 4  ;;  %v571_v52 = vrot.slane %v570_v14, 4 }
  0xe7   :  { %v417_v0 = vadd.f32 %v416_v28, %v415_v55  ;;  %v426_v1 = vadd.f32 %v425_v44, %v424_v27  ;;  %v435_v3 = vadd.f32 %v434_v58, %v433_v49 }
  0xe8   :  { %v554_v7 = vadd.f32 %v553_v62, %v552_v57  ;;  %v563_v9 = vadd.f32 %v562_v46, %v561_v18  ;;  %v572_v12 = vadd.f32 %v571_v52, %v570_v14  ;;  %v468_v15 = vpop.permute.xlu1 %467 }
  0xe9   :  { %v436_v22 = vsub.f32 0.0, %v417_v0  ;;  %v437_v41 = vsub.f32 0.0, %v426_v1  ;;  %v438_v16 = vsub.f32 0.0, %v435_v3  ;;  %v479_v17 = vmul.f32 %v468_v15, %v939_v48 }
  0xea   :  { %v555_v42 = vrot.slane %v554_v7, 2  ;;  %v564_v45 = vrot.slane %v563_v9, 2  ;;  %v573_v20 = vrot.slane %v572_v12, 2  ;;  %v480_v59 = vmul.f32 %v468_v15, %v941_v13 }
  0xeb   :  { %v442_v23 = vrot.slane %v437_v41, 7  ;;  %v481_v19 = vmul.f32 %v468_v15, %v943_v21  ;;  %v484_v29 = vadd.f32 %v483_v11, %v479_v17  ;;  %v443_v30 = vrot.slane %v438_v16, 6 }
  0xec   :  { %v556_v26 = vadd.f32 %v555_v42, %v554_v7  ;;  %v565_v33 = vadd.f32 %v564_v45, %v563_v9  ;;  %v574_v34 = vadd.f32 %v573_v20, %v572_v12  ;;  %v493_v36 = vadd.f32 %v492_v63, %v480_v59 }
  0xed   :  { %v485_v48 = vrot.slane %v484_v29, 4  ;;  %v502_v24 = vadd.f32 %v501_v61, %v481_v19  ;;  %v445_v2 = vsel %vm311_vm0, %v436_v22, %v442_v23 }
  0xee   :  { %v557_v38 = vrot.slane %v556_v26, 1  ;;  %v566_v13 = vrot.slane %v565_v33, 1  ;;  %v575_v35 = vrot.slane %v574_v34, 1  ;;  %v494_v6 = vrot.slane %v493_v36, 4 }
  0xef   :  { %v486_v21 = vadd.f32 %v485_v48, %v484_v29  ;;  %v503_v8 = vrot.slane %v502_v24, 4  ;;  %v447_v10 = vsel %vm446_vm2, %v445_v2, %v443_v30 }
  0xf0   :  { %v558_v60 = vadd.f32 %v557_v38, %v556_v26  ;;  %v567_v43 = vadd.f32 %v566_v13, %v565_v33  ;;  %v576_v53 = vadd.f32 %v575_v35, %v574_v34  ;;  %v495_v50 = vadd.f32 %v494_v6, %v493_v36  ;;  %453 = vst.msk [vmem:[#allocation5] ss:$4 sm:$0x7] %vm967_vm3, %v447_v10 }
  0xf1   :  { %v487_v40 = vrot.slane %v486_v21, 2  ;;  %v504_v5 = vadd.f32 %v503_v8, %v502_v24 }
  0xf2   :  { %v578_v39 = vsub.f32 0.0, %v567_v43  ;;  %v579_v51 = vsub.f32 0.0, %v576_v53  ;;  %v496_v4 = vrot.slane %v495_v50, 2  ;;  %v577_v54 = vsub.f32 0.0, %v558_v60 }
  0xf3   :  { %v488_v31 = vadd.f32 %v487_v40, %v486_v21  ;;  %v505_v47 = vrot.slane %v504_v5, 2 }
  0xf4   :  { %v583_v25 = vrot.slane %v578_v39, 7  ;;  %v497_v32 = vadd.f32 %v496_v4, %v495_v50  ;;  %v584_v55 = vrot.slane %v579_v51, 6 }
  0xf5   :  { %v489_v27 = vrot.slane %v488_v31, 1  ;;  %v506_v49 = vadd.f32 %v505_v47, %v504_v5 }
  0xf6   :  { %v498_v56 = vrot.slane %v497_v32, 1  ;;  %v585_v57 = vsel %vm311_vm0, %v577_v54, %v583_v25 }
  0xf7   :  { %v507_v18 = vrot.slane %v506_v49, 1  ;;  %v586_v14 = vsel %vm446_vm2, %v585_v57, %v584_v55  ;;  %v490_v28 = vadd.f32 %v489_v27, %v488_v31 }
  0xf8   :  { %v499_v44 = vadd.f32 %v498_v56, %v497_v32  ;;  %589 = vst.msk [vmem:[#allocation5 + $0x2] ss:$4 sm:$0x7] %vm967_vm3, %v586_v14 }
  0xf9   :  { %v508_v58 = vadd.f32 %v507_v18, %v506_v49  ;;  %v509_v46 = vsub.f32 0.0, %v490_v28 }
  0xfa   :  { %v510_v11 = vsub.f32 0.0, %v499_v44 }
  0xfb   :  { %v511_v62 = vsub.f32 0.0, %v508_v58 }
  0xfc   :  { %v515_v52 = vrot.slane %v510_v11, 7 }
  0xfd   :  { %v516_v63 = vrot.slane %v511_v62, 6 }
  0xfe   :  { %v517_v0 = vsel %vm311_vm0, %v509_v46, %v515_v52 }
  0xff   :  { %v518_v1 = vsel %vm446_vm2, %v517_v0, %v516_v63 }
 0x100   :  { %521 = vst.msk [vmem:[#allocation5 + $0x1] ss:$4 sm:$0x7] %vm967_vm3, %v518_v1 }
 0x101   :  { %611 = dma.vmem_to_hbm [thread:$0]  %s607_s10, 192, %s609_s12, [#allocation6]  }
 0x13e   :  { %v318_v3 = vpop.xlane.xlu0 %317 }
 0x13f   :  { %v319_v61 = vrot.slane %v318_v3, 4 }
 0x141   :  { %v320_v7 = vadd.f32 %v319_v61, %v318_v3 }
 0x143   :  { %v321_v9 = vrot.slane %v320_v7, 2 }
 0x145   :  { %v322_v12 = vadd.f32 %v321_v9, %v320_v7 }
 0x147   :  { %v323_v15 = vrot.slane %v322_v12, 1 }
 0x149   :  { %v324_v22 = vadd.f32 %v323_v15, %v322_v12 }
 0x14b   :  { %622 = vpush %v324_v22 }
 0x17c   :  { %s623_s18 = spop %622 }
 0x17d   :  { %v326_v41 = vstv %s623_s18 }
 0x17e   :  { %327 = vst [vmem:[#allocation3] sm:$0x1] %v326_v41 }
 0x17f   :  { %600 = dma.vmem_to_hbm [thread:$0]  %s596_s14, 16, %s598_s17, [#allocation4]  }
 0x180   :  { %723 = dma.done.wait [#allocation4], 16  }
 0x181   :  { %724 = vsyncadd [#allocation4], 4294967280 }
 0x182   :  { %725 = dma.done.wait [#allocation6], 192  }
 0x183   :  { %726 = vsyncadd [#allocation6], 4294967104 }
 0x184   :  { %620 = vsyncpa [#allocation4], 1 }
 0x185   :  { %621 = vsyncpa [#allocation6], 1 }

</bundles_post_ra>
